<compile_context>
chip_gen: v5e
topology: v5e:2x2
jax: 0.10.0
libtpu: 0.0.40
codegen_flags: <defaults>
</compile_context>

<pallas_src>
import math

import jax
import jax.numpy as jnp
from jax.experimental import pallas as pl
from jax.experimental.pallas import tpu as pltpu

# ----------------------------- config (small) --------------------------------
BATCH = 2
SEQ_LEN = 8
D_MODEL = 8
STATE_SIZE = 16

D2 = 2 * D_MODEL            # 16  (S6 width)
NSTATE = STATE_SIZE         # 16
R = BATCH * SEQ_LEN         # 16  (flattened rows B*L)
R2 = 2 * R                  # 32
R3 = 3 * R                  # 48
LANES = 128
EPS = 1e-5

# column layout of the fused input-projection output: [xp | left | right | z_pre]
C_XP = 0
C_LT = D2
C_RT = 2 * D2
C_Z = 3 * D2
XZ_COLS = 4 * D2            # 64

# column layout of the fused conv_linear + S6 projection output (exactly 128 lanes):
# [u_f | u_b | (dpre_f | B_f | C_f) | (dpre_b | B_b | C_b)]
C_UF = 0
C_UB = D2
C_PF = 2 * D2                       # 32
C_PB = C_PF + D2 + 2 * NSTATE       # 80
BIG_COLS = C_PB + D2 + 2 * NSTATE   # 128
assert BIG_COLS == LANES

# row layout of the packed weight slab (all block starts 8-row aligned)
ROW_VEC = 0                 # row 0: rmsw | row 1: bxz | row 2: bbig | row 3: bo
ROW_WXZ = 8                 # (D_MODEL, 4*D2)
ROW_WCONV = ROW_WXZ + 8     # (2R, 3R)
ROW_BCONV = ROW_WCONV + R2  # (2R, D2)  conv bias pre-broadcast over features
ROW_WBIG = ROW_BCONV + R2   # (2*D2, 128)
ROW_WO = ROW_WBIG + 2 * D2  # (D2, 128)
SLAB_ROWS = ROW_WO + D2     # 128


def _silu(v):
    return v * (1.0 / (1.0 + jnp.exp(-v)))


def _softplus(v):
    # matches F.softplus (threshold=20) for the value range used here
    return jnp.where(v > 20.0, v, jnp.log(1.0 + jnp.exp(v)))


# ------------------------------- kernel --------------------------------------
def vim_encoder_kernel(x_ref, w_ref, o_ref):
    x = x_ref[...]                                            # (R, D)

    # RMSNorm
    rmsw = w_ref[0:1, 0:D_MODEL]                              # (1, D)
    xn = x * jax.lax.rsqrt(jnp.mean(x * x, axis=-1, keepdims=True) + EPS) * rmsw

    # fused input projection: [xp | xp<<shift | xp>>shift | z_pre] in ONE matmul;
    # the conv's +/-1 feature shifts (with zero padding) are pre-folded into the
    # weight columns, so no roll / shift matmuls are needed in the kernel.
    wxz = w_ref[ROW_WXZ:ROW_WXZ + D_MODEL, 0:XZ_COLS]         # (D, 64)
    bxz = w_ref[1:2, 0:XZ_COLS]                               # (1, 64)
    xz = jnp.dot(xn, wxz, preferred_element_type=jnp.float32) + bxz   # (R, 64)
    xp = xz[:, C_XP:C_XP + D2]
    left = xz[:, C_LT:C_LT + D2]
    right = xz[:, C_RT:C_RT + D2]
    z = _silu(xz[:, C_Z:C_Z + D2])

    # k=3 / pad=1 conv over the FEATURE axis (seq treated as channels).
    # Forward + backward branches, the seq-flip and the batch block-diagonal are
    # folded into `wconv` -> one matmul over the tap-stacked slab.
    stacked = jnp.concatenate([left, xp, right], axis=0)      # (3R, D2)
    wconv = w_ref[ROW_WCONV:ROW_WCONV + R2, 0:R3]             # (2R, 3R)
    bconv = w_ref[ROW_BCONV:ROW_BCONV + R2, 0:D2]             # (2R, D2)
    conv_act = _silu(
        jnp.dot(wconv, stacked, preferred_element_type=jnp.float32) + bconv)  # (2R, D2)

    # Move the fwd/bwd branches onto lanes, then ONE matmul computes
    # for_conv_linear (applied to BOTH branches, as in the module) AND the fused
    # fc1|fc2|fc3 projections of BOTH S6 blocks -> exactly 128 output lanes.
    conv2 = jnp.concatenate([conv_act[:R], conv_act[R:]], axis=1)      # (R, 2*D2)
    wbig = w_ref[ROW_WBIG:ROW_WBIG + 2 * D2, :]               # (2*D2, 128)
    bbig = w_ref[2:3, :]                                      # (1, 128)
    big = jnp.dot(conv2, wbig, preferred_element_type=jnp.float32) + bbig  # (R, 128)

    # S6 collapsed algebraically (h0 == 0):  y = u * delta * sum_n(C*B)
    # (the exp(delta*A)*0 term of the PyTorch module is dead and dropped)
    def s6(u, p0):
        delta = _softplus(big[:, p0:p0 + D2])
        bm = big[:, p0 + D2:p0 + D2 + NSTATE]
        cm = big[:, p0 + D2 + NSTATE:p0 + D2 + 2 * NSTATE]
        return _silu(u * delta * jnp.sum(cm * bm, axis=-1, keepdims=True))

    y_f = s6(big[:, C_UF:C_UF + D2], C_PF)
    y_b = s6(big[:, C_UB:C_UB + D2], C_PB)   # stays in back-conv channel order, as in the module

    comb = (y_f + y_b) * z                                    # (R, D2)

    # lane-dense (128-wide) output: cols D..127 are zero, sliced off in the wrapper
    wo = w_ref[ROW_WO:ROW_WO + D2, :]                         # (D2, 128)
    bo = w_ref[3:4, :]                                        # (1, 128)
    o_ref[...] = jnp.dot(comb, wo, preferred_element_type=jnp.float32) + bo


# --------------------- one-time parameter fusion / packing --------------------
def _block_diag2(a, b):
    za = jnp.zeros((a.shape[0], b.shape[1]), a.dtype)
    zb = jnp.zeros((b.shape[0], a.shape[1]), b.dtype)
    return jnp.concatenate(
        [jnp.concatenate([a, za], axis=1), jnp.concatenate([zb, b], axis=1)], axis=0)


def _batch_block_diag(w, nb):
    l = w.shape[0]
    return jnp.einsum("ab,ij->aibj", jnp.eye(nb, dtype=w.dtype), w).reshape(nb * l, nb * l)


def prepare_params(p):
    """Fold, fuse and pack all weights into ONE (128, 128) f32 slab.
    Runs once per parameter set -- nothing here is on the per-call path."""
    d, d2, b = D_MODEL, D2, BATCH

    # input projection with the conv's +/-1 feature shifts folded in:
    #   left[:, m]  = xp[:, m-1] (0 at m=0)  -> shift weight/bias columns right
    #   right[:, m] = xp[:, m+1] (0 at last) -> shift columns left
    def shift_cols(w, bias, k):
        w0 = jnp.zeros_like(w)
        b0 = jnp.zeros_like(bias)
        if k == 1:
            return w0.at[:, 1:].set(w[:, :-1]), b0.at[:, 1:].set(bias[:, :-1])
        return w0.at[:, :-1].set(w[:, 1:]), b0.at[:, :-1].set(bias[:, 1:])

    wx_l, bx_l = shift_cols(p["wx"], p["bx"], 1)
    wx_r, bx_r = shift_cols(p["wx"], p["bx"], -1)
    wxz = jnp.concatenate([p["wx"], wx_l, wx_r, p["wz"]], axis=1)          # (D, 64)
    bxz = jnp.concatenate([p["bx"], bx_l, bx_r, p["bz"]], axis=1)          # (1, 64)

    # conv: seq-flip folded into the backward weight (cwb[k][:, ::-1]), batch
    # block-diagonal, taps concatenated along columns.
    cwb_f = p["cwb"][:, :, ::-1]
    wconv = jnp.concatenate(
        [jnp.concatenate([_batch_block_diag(p["cwf"][k], b),
                          _batch_block_diag(cwb_f[k], b)], axis=0)
         for k in range(3)], axis=1)                                       # (2R, 3R)
    bconv = jnp.concatenate([jnp.tile(p["cbf"], (b, 1)),
                             jnp.tile(p["cbb"], (b, 1))], axis=0)          # (2R, 1)
    bconv_bc = jnp.tile(bconv, (1, d2))                                    # (2R, D2)

    # for_conv_linear (both branches) folded together with the block-diagonal
    # fused S6 projections: Wbig = [wcl2 | wcl2 @ blockdiag(wf, wg)]  -> (2*D2, 128)
    wf = jnp.concatenate([p["f1w"], p["f2w"], p["f3w"]], axis=1)           # (D2, D2+2N)
    bf = jnp.concatenate([p["f1b"], p["f2b"], p["f3b"]], axis=1)
    wg = jnp.concatenate([p["g1w"], p["g2w"], p["g3w"]], axis=1)
    bg = jnp.concatenate([p["g1b"], p["g2b"], p["g3b"]], axis=1)
    wfg = _block_diag2(wf, wg)                                             # (2*D2, 2*(D2+2N))
    bfg = jnp.concatenate([bf, bg], axis=1)
    wcl2 = _block_diag2(p["wcl"], p["wcl"])                                # (2*D2, 2*D2)
    bcl2 = jnp.concatenate([p["bcl"], p["bcl"]], axis=1)
    wbig = jnp.concatenate([wcl2, wcl2 @ wfg], axis=1)                     # (2*D2, 128)
    bbig = jnp.concatenate([bcl2, bcl2 @ wfg + bfg], axis=1)               # (1, 128)

    # lane-dense out projection (pad to 128 output lanes with zeros)
    wo = jnp.zeros((d2, LANES), jnp.float32).at[:, :d].set(p["wo"])
    bo = jnp.zeros((1, LANES), jnp.float32).at[:, :d].set(p["bo"])

    slab = jnp.zeros((SLAB_ROWS, LANES), jnp.float32)
    slab = slab.at[0, :d].set(p["rmsw"][0])
    slab = slab.at[1, :XZ_COLS].set(bxz[0])
    slab = slab.at[2, :].set(bbig[0])
    slab = slab.at[3, :].set(bo[0])
    slab = slab.at[ROW_WXZ:ROW_WXZ + d, :XZ_COLS].set(wxz)
    slab = slab.at[ROW_WCONV:ROW_WCONV + R2, :R3].set(wconv)
    slab = slab.at[ROW_BCONV:ROW_BCONV + R2, :d2].set(bconv_bc)
    slab = slab.at[ROW_WBIG:ROW_WBIG + 2 * d2, :].set(wbig)
    slab = slab.at[ROW_WO:ROW_WO + d2, :].set(wo)
    return slab


# ------------------------------- wrapper --------------------------------------
@jax.jit
def vim_encoder(x, weight_slab):
    b, l, d = x.shape
    x_flat = x.reshape(b * l, d)
    out = pl.pallas_call(
        vim_encoder_kernel,
        out_shape=jax.ShapeDtypeStruct((b * l, LANES), jnp.float32),
        # single program (grid=()), both operands resident in VMEM as full blocks
        in_specs=[pl.BlockSpec(memory_space=pltpu.MemorySpace.VMEM),
                  pl.BlockSpec(memory_space=pltpu.MemorySpace.VMEM)],
        out_specs=pl.BlockSpec(memory_space=pltpu.MemorySpace.VMEM),
    )(x_flat, weight_slab)
    return out[:, :d].reshape(b, l, d)


# ------------------------ deterministic parameter init ------------------------
def init_params(key):
    keys = iter(jax.random.split(key, 32))

    def lin(fan_in, fan_out):
        bound = 1.0 / math.sqrt(fan_in)
        w = jax.random.uniform(next(keys), (fan_in, fan_out), jnp.float32, -bound, bound)
        b = jax.random.uniform(next(keys), (1, fan_out), jnp.float32, -bound, bound)
        return w, b

    p = {}
    p["rmsw"] = jnp.ones((1, D_MODEL), jnp.float32)                     # RMSNorm weight
    p["wx"], p["bx"] = lin(D_MODEL, D2)                                 # x_in_proj
    p["wz"], p["bz"] = lin(D_MODEL, D2)                                 # z_in_proj
    cb = 1.0 / math.sqrt(SEQ_LEN * 3)
    p["cwf"] = jax.random.uniform(next(keys), (3, SEQ_LEN, SEQ_LEN), jnp.float32, -cb, cb)
    p["cbf"] = jax.random.uniform(next(keys), (SEQ_LEN, 1), jnp.float32, -cb, cb)
    p["cwb"] = jax.random.uniform(next(keys), (3, SEQ_LEN, SEQ_LEN), jnp.float32, -cb, cb)
    p["cbb"] = jax.random.uniform(next(keys), (SEQ_LEN, 1), jnp.float32, -cb, cb)
    p["wcl"], p["bcl"] = lin(D2, D2)                                    # for_conv_linear
    for pre in ("f", "g"):                                              # forward / backward S6
        p[pre + "1w"], p[pre + "1b"] = lin(D2, D2)                      # fc1
        p[pre + "2w"], p[pre + "2b"] = lin(D2, STATE_SIZE)              # fc2
        p[pre + "3w"], p[pre + "3b"] = lin(D2, STATE_SIZE)              # fc3
        xav = math.sqrt(6.0 / (D2 + STATE_SIZE))
        p[pre + "A"] = jax.random.uniform(next(keys), (D2, STATE_SIZE), jnp.float32, -xav, xav)
    p["wo"], _ = lin(D2, D_MODEL)                                       # out_proj weight
    p["bo"] = jnp.ones((1, D_MODEL), jnp.float32)                       # out_proj.bias = 1.0
    return p


# --------------------------- pure-JAX reference --------------------------------
# Faithful to the PyTorch module (separate matmuls, explicit flip, dA*0 term).
def reference(x, p):
    xn = x * jax.lax.rsqrt(jnp.mean(x * x, -1, keepdims=True) + EPS) * p["rmsw"][0]
    xp = xn @ p["wx"] + p["bx"][0]
    z = _silu(xn @ p["wz"] + p["bz"][0])
    x_back = xp[:, ::-1, :]

    def conv(inp, w, b):
        zc = jnp.zeros_like(inp[:, :, :1])
        left = jnp.concatenate([zc, inp[:, :, :-1]], axis=2)
        right = jnp.concatenate([inp[:, :, 1:], zc], axis=2)
        return (jnp.einsum("oi,bim->bom", w[0], left)
                + jnp.einsum("oi,bim->bom", w[1], inp)
                + jnp.einsum("oi,bim->bom", w[2], right)
                + b[None, :, :])

    xf = _silu(conv(xp, p["cwf"], p["cbf"])) @ p["wcl"] + p["bcl"][0]
    xb = _silu(conv(x_back, p["cwb"], p["cbb"])) @ p["wcl"] + p["bcl"][0]

    def s6(u, pre):
        delta = _softplus(u @ p[pre + "1w"] + p[pre + "1b"][0])
        bm = u @ p[pre + "2w"] + p[pre + "2b"][0]
        cm = u @ p[pre + "3w"] + p[pre + "3b"][0]
        da = jnp.exp(delta[..., None] * p[pre + "A"])
        h = da * 0.0 + u[..., None] * (delta[..., None] * bm[:, :, None, :])
        return jnp.einsum("bln,bldn->bld", cm, h)

    yf = _silu(s6(xf, "f"))
    yb = _silu(s6(xb, "g"))
    comb = yf * z + yb * z
    return comb @ p["wo"] + p["bo"][0]


if __name__ == "__main__":
    key = jax.random.PRNGKey(0)
    kx, kp = jax.random.split(key)
    x = jax.random.normal(kx, (BATCH, SEQ_LEN, D_MODEL), jnp.float32)
    params = init_params(kp)

    # one-time weight fusion/packing (off the per-call path)
    weight_slab = jax.block_until_ready(prepare_params(params))

    out = vim_encoder(x, weight_slab)
    jax.block_until_ready(out)

    ref = reference(x, params)
    assert out.shape == (BATCH, SEQ_LEN, D_MODEL)
    err = float(jnp.max(jnp.abs(out - ref)))
    assert jnp.allclose(out, ref, rtol=2e-4, atol=2e-4), err
    print("KERNEL_OK")
</pallas_src>

<mosaic_0001>
module attributes {stable_mosaic.version = 11 : i64} {
  func.func @vim_encoder_kernel(%arg0: memref<16x8xf32, #tpu.memory_space<vmem>>, %arg1: memref<128x128xf32, #tpu.memory_space<vmem>>, %arg2: memref<16x128xf32, #tpu.memory_space<vmem>>) attributes {dimension_semantics = [], scalar_prefetch = 0 : i64, scratch_operands = 0 : i64, tpu.core_type = #tpu.core_type<tc>} {
    %c0 = arith.constant 0 : index
    %c0_0 = arith.constant 0 : index
    %0 = vector.load %arg0[%c0, %c0_0] : memref<16x8xf32, #tpu.memory_space<vmem>>, vector<16x8xf32>
    %c0_1 = arith.constant 0 : index
    %c0_2 = arith.constant 0 : index
    %1 = vector.load %arg1[%c0_1, %c0_2] : memref<128x128xf32, #tpu.memory_space<vmem>>, vector<1x8xf32>
    %2 = arith.mulf %0, %0 : vector<16x8xf32>
    %cst = arith.constant dense<0.000000e+00> : vector<16xf32>
    %3 = vector.multi_reduction <add>, %2, %cst [1] : vector<16x8xf32> to vector<16xf32>
    %4 = vector.shape_cast %3 : vector<16xf32> to vector<16x1xf32>
    %cst_3 = arith.constant 8.000000e+00 : f32
    %5 = vector.broadcast %cst_3 : f32 to vector<16x1xf32>
    %6 = arith.divf %4, %5 : vector<16x1xf32>
    %cst_4 = arith.constant 9.99999974E-6 : f32
    %7 = vector.broadcast %cst_4 : f32 to vector<16x1xf32>
    %8 = arith.addf %6, %7 : vector<16x1xf32>
    %9 = math.rsqrt %8 : vector<16x1xf32>
    %10 = vector.broadcast %9 : vector<16x1xf32> to vector<16x8xf32>
    %11 = arith.mulf %0, %10 : vector<16x8xf32>
    %12 = vector.broadcast %1 : vector<1x8xf32> to vector<16x8xf32>
    %13 = arith.mulf %11, %12 : vector<16x8xf32>
    %c8 = arith.constant 8 : index
    %c0_5 = arith.constant 0 : index
    %14 = vector.load %arg1[%c8, %c0_5] : memref<128x128xf32, #tpu.memory_space<vmem>>, vector<8x64xf32>
    %c1 = arith.constant 1 : index
    %c0_6 = arith.constant 0 : index
    %15 = vector.load %arg1[%c1, %c0_6] : memref<128x128xf32, #tpu.memory_space<vmem>>, vector<1x64xf32>
    %cst_7 = arith.constant dense<0.000000e+00> : vector<16x64xf32>
    %16 = tpu.matmul %13, %14, %cst_7 {dimension_numbers = #tpu.dot_dimension_numbers<[1], [0], [0], [1], [0, 0, 1, 1], [], []>} : vector<16x8xf32>, vector<8x64xf32>, vector<16x64xf32> -> vector<16x64xf32>
    %17 = vector.broadcast %15 : vector<1x64xf32> to vector<16x64xf32>
    %18 = arith.addf %16, %17 : vector<16x64xf32>
    %19 = vector.extract_strided_slice %18 {offsets = [0, 0], sizes = [16, 16], strides = [1, 1]} : vector<16x64xf32> to vector<16x16xf32>
    %20 = vector.extract_strided_slice %18 {offsets = [0, 16], sizes = [16, 16], strides = [1, 1]} : vector<16x64xf32> to vector<16x16xf32>
    %21 = vector.extract_strided_slice %18 {offsets = [0, 32], sizes = [16, 16], strides = [1, 1]} : vector<16x64xf32> to vector<16x16xf32>
    %22 = vector.extract_strided_slice %18 {offsets = [0, 48], sizes = [16, 16], strides = [1, 1]} : vector<16x64xf32> to vector<16x16xf32>
    %cst_8 = arith.constant 0.000000e+00 : f32
    %23 = vector.broadcast %cst_8 : f32 to vector<16x16xf32>
    %24 = arith.subf %23, %22 : vector<16x16xf32>
    %25 = math.exp %24 : vector<16x16xf32>
    %cst_9 = arith.constant 1.000000e+00 : f32
    %26 = vector.broadcast %cst_9 : f32 to vector<16x16xf32>
    %27 = arith.addf %26, %25 : vector<16x16xf32>
    %cst_10 = arith.constant 1.000000e+00 : f32
    %28 = vector.broadcast %cst_10 : f32 to vector<16x16xf32>
    %29 = arith.divf %28, %27 : vector<16x16xf32>
    %30 = arith.mulf %22, %29 : vector<16x16xf32>
    %31 = tpu.concatenate %20, %19, %21 in 0 : vector<16x16xf32>, vector<16x16xf32>, vector<16x16xf32> -> vector<48x16xf32>
    %c16 = arith.constant 16 : index
    %c0_11 = arith.constant 0 : index
    %32 = vector.load %arg1[%c16, %c0_11] : memref<128x128xf32, #tpu.memory_space<vmem>>, vector<32x48xf32>
    %c48 = arith.constant 48 : index
    %c0_12 = arith.constant 0 : index
    %33 = vector.load %arg1[%c48, %c0_12] : memref<128x128xf32, #tpu.memory_space<vmem>>, vector<32x16xf32>
    %cst_13 = arith.constant dense<0.000000e+00> : vector<32x16xf32>
    %34 = tpu.matmul %32, %31, %cst_13 {dimension_numbers = #tpu.dot_dimension_numbers<[1], [0], [0], [1], [0, 0, 1, 1], [], []>} : vector<32x48xf32>, vector<48x16xf32>, vector<32x16xf32> -> vector<32x16xf32>
    %35 = arith.addf %34, %33 : vector<32x16xf32>
    %cst_14 = arith.constant 0.000000e+00 : f32
    %36 = vector.broadcast %cst_14 : f32 to vector<32x16xf32>
    %37 = arith.subf %36, %35 : vector<32x16xf32>
    %38 = math.exp %37 : vector<32x16xf32>
    %cst_15 = arith.constant 1.000000e+00 : f32
    %39 = vector.broadcast %cst_15 : f32 to vector<32x16xf32>
    %40 = arith.addf %39, %38 : vector<32x16xf32>
    %cst_16 = arith.constant 1.000000e+00 : f32
    %41 = vector.broadcast %cst_16 : f32 to vector<32x16xf32>
    %42 = arith.divf %41, %40 : vector<32x16xf32>
    %43 = arith.mulf %35, %42 : vector<32x16xf32>
    %44 = vector.extract_strided_slice %43 {offsets = [0, 0], sizes = [16, 16], strides = [1, 1]} : vector<32x16xf32> to vector<16x16xf32>
    %45 = vector.extract_strided_slice %43 {offsets = [16, 0], sizes = [16, 16], strides = [1, 1]} : vector<32x16xf32> to vector<16x16xf32>
    %46 = tpu.concatenate %44, %45 in 1 : vector<16x16xf32>, vector<16x16xf32> -> vector<16x32xf32>
    %c80 = arith.constant 80 : index
    %c0_17 = arith.constant 0 : index
    %47 = vector.load %arg1[%c80, %c0_17] : memref<128x128xf32, #tpu.memory_space<vmem>>, vector<32x128xf32>
    %c2 = arith.constant 2 : index
    %c0_18 = arith.constant 0 : index
    %48 = vector.load %arg1[%c2, %c0_18] : memref<128x128xf32, #tpu.memory_space<vmem>>, vector<1x128xf32>
    %cst_19 = arith.constant dense<0.000000e+00> : vector<16x128xf32>
    %49 = tpu.matmul %46, %47, %cst_19 {dimension_numbers = #tpu.dot_dimension_numbers<[1], [0], [0], [1], [0, 0, 1, 1], [], []>} : vector<16x32xf32>, vector<32x128xf32>, vector<16x128xf32> -> vector<16x128xf32>
    %50 = vector.broadcast %48 : vector<1x128xf32> to vector<16x128xf32>
    %51 = arith.addf %49, %50 : vector<16x128xf32>
    %52 = vector.extract_strided_slice %51 {offsets = [0, 0], sizes = [16, 16], strides = [1, 1]} : vector<16x128xf32> to vector<16x16xf32>
    %53 = vector.extract_strided_slice %51 {offsets = [0, 32], sizes = [16, 16], strides = [1, 1]} : vector<16x128xf32> to vector<16x16xf32>
    %cst_20 = arith.constant 2.000000e+01 : f32
    %54 = vector.broadcast %cst_20 : f32 to vector<16x16xf32>
    %55 = arith.cmpf ogt, %53, %54 : vector<16x16xf32>
    %56 = math.exp %53 : vector<16x16xf32>
    %cst_21 = arith.constant 1.000000e+00 : f32
    %57 = vector.broadcast %cst_21 : f32 to vector<16x16xf32>
    %58 = arith.addf %57, %56 : vector<16x16xf32>
    %59 = math.log %58 : vector<16x16xf32>
    %60 = arith.select %55, %53, %59 : vector<16x16xi1>, vector<16x16xf32>
    %61 = vector.extract_strided_slice %51 {offsets = [0, 48], sizes = [16, 16], strides = [1, 1]} : vector<16x128xf32> to vector<16x16xf32>
    %62 = vector.extract_strided_slice %51 {offsets = [0, 64], sizes = [16, 16], strides = [1, 1]} : vector<16x128xf32> to vector<16x16xf32>
    %63 = arith.mulf %52, %60 : vector<16x16xf32>
    %64 = arith.mulf %62, %61 : vector<16x16xf32>
    %cst_22 = arith.constant dense<0.000000e+00> : vector<16xf32>
    %65 = vector.multi_reduction <add>, %64, %cst_22 [1] : vector<16x16xf32> to vector<16xf32>
    %66 = vector.shape_cast %65 : vector<16xf32> to vector<16x1xf32>
    %67 = vector.broadcast %66 : vector<16x1xf32> to vector<16x16xf32>
    %68 = arith.mulf %63, %67 : vector<16x16xf32>
    %cst_23 = arith.constant 0.000000e+00 : f32
    %69 = vector.broadcast %cst_23 : f32 to vector<16x16xf32>
    %70 = arith.subf %69, %68 : vector<16x16xf32>
    %71 = math.exp %70 : vector<16x16xf32>
    %cst_24 = arith.constant 1.000000e+00 : f32
    %72 = vector.broadcast %cst_24 : f32 to vector<16x16xf32>
    %73 = arith.addf %72, %71 : vector<16x16xf32>
    %cst_25 = arith.constant 1.000000e+00 : f32
    %74 = vector.broadcast %cst_25 : f32 to vector<16x16xf32>
    %75 = arith.divf %74, %73 : vector<16x16xf32>
    %76 = arith.mulf %68, %75 : vector<16x16xf32>
    %77 = vector.extract_strided_slice %51 {offsets = [0, 16], sizes = [16, 16], strides = [1, 1]} : vector<16x128xf32> to vector<16x16xf32>
    %78 = vector.extract_strided_slice %51 {offsets = [0, 80], sizes = [16, 16], strides = [1, 1]} : vector<16x128xf32> to vector<16x16xf32>
    %cst_26 = arith.constant 2.000000e+01 : f32
    %79 = vector.broadcast %cst_26 : f32 to vector<16x16xf32>
    %80 = arith.cmpf ogt, %78, %79 : vector<16x16xf32>
    %81 = math.exp %78 : vector<16x16xf32>
    %cst_27 = arith.constant 1.000000e+00 : f32
    %82 = vector.broadcast %cst_27 : f32 to vector<16x16xf32>
    %83 = arith.addf %82, %81 : vector<16x16xf32>
    %84 = math.log %83 : vector<16x16xf32>
    %85 = arith.select %80, %78, %84 : vector<16x16xi1>, vector<16x16xf32>
    %86 = vector.extract_strided_slice %51 {offsets = [0, 96], sizes = [16, 16], strides = [1, 1]} : vector<16x128xf32> to vector<16x16xf32>
    %87 = vector.extract_strided_slice %51 {offsets = [0, 112], sizes = [16, 16], strides = [1, 1]} : vector<16x128xf32> to vector<16x16xf32>
    %88 = arith.mulf %77, %85 : vector<16x16xf32>
    %89 = arith.mulf %87, %86 : vector<16x16xf32>
    %cst_28 = arith.constant dense<0.000000e+00> : vector<16xf32>
    %90 = vector.multi_reduction <add>, %89, %cst_28 [1] : vector<16x16xf32> to vector<16xf32>
    %91 = vector.shape_cast %90 : vector<16xf32> to vector<16x1xf32>
    %92 = vector.broadcast %91 : vector<16x1xf32> to vector<16x16xf32>
    %93 = arith.mulf %88, %92 : vector<16x16xf32>
    %cst_29 = arith.constant 0.000000e+00 : f32
    %94 = vector.broadcast %cst_29 : f32 to vector<16x16xf32>
    %95 = arith.subf %94, %93 : vector<16x16xf32>
    %96 = math.exp %95 : vector<16x16xf32>
    %cst_30 = arith.constant 1.000000e+00 : f32
    %97 = vector.broadcast %cst_30 : f32 to vector<16x16xf32>
    %98 = arith.addf %97, %96 : vector<16x16xf32>
    %cst_31 = arith.constant 1.000000e+00 : f32
    %99 = vector.broadcast %cst_31 : f32 to vector<16x16xf32>
    %100 = arith.divf %99, %98 : vector<16x16xf32>
    %101 = arith.mulf %93, %100 : vector<16x16xf32>
    %102 = arith.addf %76, %101 : vector<16x16xf32>
    %103 = arith.mulf %102, %30 : vector<16x16xf32>
    %c112 = arith.constant 112 : index
    %c0_32 = arith.constant 0 : index
    %104 = vector.load %arg1[%c112, %c0_32] : memref<128x128xf32, #tpu.memory_space<vmem>>, vector<16x128xf32>
    %c3 = arith.constant 3 : index
    %c0_33 = arith.constant 0 : index
    %105 = vector.load %arg1[%c3, %c0_33] : memref<128x128xf32, #tpu.memory_space<vmem>>, vector<1x128xf32>
    %cst_34 = arith.constant dense<0.000000e+00> : vector<16x128xf32>
    %106 = tpu.matmul %103, %104, %cst_34 {dimension_numbers = #tpu.dot_dimension_numbers<[1], [0], [0], [1], [0, 0, 1, 1], [], []>} : vector<16x16xf32>, vector<16x128xf32>, vector<16x128xf32> -> vector<16x128xf32>
    %107 = vector.broadcast %105 : vector<1x128xf32> to vector<16x128xf32>
    %108 = arith.addf %106, %107 : vector<16x128xf32>
    %c0_35 = arith.constant 0 : index
    %c0_36 = arith.constant 0 : index
    %109 = vector.load %arg2[%c0_35, %c0_36] : memref<16x128xf32, #tpu.memory_space<vmem>>, vector<16x128xf32>
    tpu.vector_store %arg2[%c0_35, %c0_36], %108 {strides = array<i32>} : memref<16x128xf32, #tpu.memory_space<vmem>>, vector<16x128xf32>,
    return
  }
}

</mosaic_0001>

<bundles_post_ra>
// kernel: vim_encoder.1
= control target key start
LH: loop header
LB: loop body
LE: loop exit
PB: predicated region body
PF: predicated region fallthrough
CT: control target
= control target key end

     0   :  { %7 = vsyncpa [#allocation3], 0  ;;  %s826_s0 = inlined_call_operand.hbm [shape: f32[16,8], index: 0, kind: input, shape index: {}]   ;;  %s827_s1 = inlined_call_operand.hbm [shape: f32[128,128], index: 1, kind: input, shape index: {}]   ;;  %s828_s2 = inlined_call_operand.vmem [shape: f32[16,128], index: 2, kind: output, shape index: {}]  }
   0x1   :  { %s13_s11 = sshll.u32 %s826_s0, 4  ;;  %s14_s11 = int_to_ptr.hbm [resolvable:$true] %s13_s11 }
   0x2   :  { %8 = vsyncpa [#allocation5], 0  ;;  %s733_s12 = smov [#allocation2]   ;;  %s26_s16 = sshll.u32 %s827_s1, 4  ;;  %s27_s16 = int_to_ptr.hbm [resolvable:$true] %s26_s16 }
   0x3   :  { %s15_s13 = sshll.u32 %s733_s12, 4  ;;  %s734_s17 = smov 128   ;;  %s16_s13 = int_to_ptr.vmem [resolvable:$true] %s15_s13 }
   0x4   :  { %s735_s18 = smov 8   ;;  %s736_s19 = smov [#allocation4]  }
   0x5   :  { %21 = dma.hbm_to_vmem [thread:$0]  %s14_s11, 256, %s16_s13, [#allocation3], %s734_s17, %s734_s17, %s735_s18  }
   0x6   :  { %s28_s20 = sshll.u32 %s736_s19, 4  ;;  %s29_s20 = int_to_ptr.vmem [resolvable:$true] %s28_s20 }
   0x7   :  { %34 = dma.hbm_to_vmem [thread:$0]  %s27_s16, 2048, %s29_s20, [#allocation5], %s734_s17, %s734_s17, %s735_s18  }
   0x8   :  { %729 = dma.done.wait [#allocation3], 256  }
   0x9   :  { %730 = vsyncadd [#allocation3], 4294967040 }
   0xa   :  { %731 = dma.done.wait [#allocation5], 2048  }
   0xb   :  { %732 = vsyncadd [#allocation5], 4294965248  ;;  %v43_v0 = vld [vmem:[#allocation2] sm:$0xff]  ;;  %vm48_vm0 = vcmask 64512   ;;  %v44_v2 = vld [vmem:[#allocation2 + $0x8] sm:$0xff]  ;;  %v737_v6 = vmov 8.0  }
   0xc   :  { %v46_v1 = vmul.f32 %v43_v0, %v43_v0  ;;  %v47_v4 = vmul.f32 %v44_v2, %v44_v2  ;;  %627 = vrcp.f32 %v737_v6  ;;  %v91_v11 = vld [vmem:[#allocation4 + $0x8] sm:$0xff]  ;;  %v623_v28 = vld [vmem:[#allocation4] ss:$0 sm:$0xff]  ;;  %v624_v40 = vld [vmem:[#allocation4 + $0x1] ss:$0 sm:$0xff]  ;;  %s738_s0 = smov 112  }
   0xd   :  { %115 = vmatpush.msra.mxu0 %v91_v11  ;;  %s739_s1 = smov 16   ;;  %v175_v55 = vld [vmem:[#allocation4 + $0x20] sm:$0xff]  ;;  %vm195_vm8 = vcmask 392192   ;;  %v173_v56 = vld [vmem:[#allocation4 + $0x10] sm:$0xff]  ;;  %v176_v57 = vld [vmem:[#allocation4 + $0x28] sm:$0xff]  ;;  %s740_s21 = smov 64  }
   0xe   :  { %v49_v3 = vsel %vm48_vm0, %v46_v1, 0.0  ;;  %v52_v5 = vsel %vm48_vm0, %v47_v4, 0.0  ;;  %v174_v58 = vld [vmem:[#allocation4 + $0x18] sm:$0xff]  ;;  %v179_v59 = vld [vmem:[#allocation4 + $0x40] sm:$0xff]  ;;  %s741_s22 = smov 96   ;;  %s742_s23 = smov 80  }
   0xf   :  { %50 = vadd.xlane.f32.xlu0 %v49_v3 }
  0x12   :  { %v628_v7 = vpop.eup %627 }
  0x13   :  { %v56_v8 = vmul.f32 8.0, %v628_v7  ;;  %vm60_vm1 = vweird.f32 %v628_v7 }
  0x15   :  { %v57_v9 = vsub.f32 1.0, %v56_v8  ;;  %v331_v8 = vld [vmem:[#allocation4 + $0x68] sm:$0xff] }
  0x16   :  { %353 = vmatpush.msra.mxu2 %v331_v8 }
  0x17   :  { %53 = vadd.xlane.f32.xlu0 %v52_v5  ;;  %v58_v10 = vmul.f32 %v628_v7, %v57_v9  ;;  %v330_v9 = vld [vmem:[#allocation4 + $0x60] sm:$0xff] }
  0x18   :  { %354 = vmatpush.msra.mxu2 %v330_v9 }
  0x19   :  { %v59_v12 = vadd.f32 %v628_v7, %v58_v10 }
  0x1b   :  { %v61_v13 = vsel %vm60_vm1, %v628_v7, %v59_v12 }
  0x82   :  { %v51_v14 = vpop.xlane.xlu0 %50 }
  0x83   :  { %v62_v15 = vmul.f32 %v61_v13, %v51_v14 }
  0x85   :  { %v64_v16 = vadd.f32 1e-05, %v62_v15 }
  0x87   :  { %629 = vrsqrt.f32 %v64_v16  ;;  %vm72_vm3 = vweird.f32 %v64_v16 }
  0x8a   :  { %v54_v17 = vpop.xlane.xlu0 %53 }
  0x8b   :  { %v63_v18 = vmul.f32 %v61_v13, %v54_v17  ;;  %v329_v13 = vld [vmem:[#allocation4 + $0x58] sm:$0xff] }
  0x8c   :  { %355 = vmatpush.msra.mxu2 %v329_v13  ;;  %v625_v13 = vld [vmem:[#allocation4 + $0x2] ss:$0 sm:$0xff] }
  0x8d   :  { %v630_v19 = vpop.eup %629  ;;  %v65_v20 = vadd.f32 1e-05, %v63_v18 }
  0x8e   :  { %v67_v21 = vmul.f32 %v630_v19, %v64_v16  ;;  %vm73_vm2 = vweird.f32 %v630_v19 }
  0x8f   :  { %631 = vrsqrt.f32 %v65_v20  ;;  %vm74_vm4 = vmor %vm72_vm3, %vm73_vm2  ;;  %vm82_vm6 = vweird.f32 %v65_v20 }
  0x90   :  { %v68_v22 = vmul.f32 %v630_v19, %v67_v21 }
  0x92   :  { %v69_v23 = vmul.f32 0.5, %v68_v22 }
  0x94   :  { %v70_v24 = vsub.f32 1.5, %v69_v23 }
  0x95   :  { %v632_v25 = vpop.eup %631 }
  0x96   :  { %v71_v26 = vmul.f32 %v630_v19, %v70_v24  ;;  %v77_v27 = vmul.f32 %v632_v25, %v65_v20  ;;  %vm83_vm5 = vweird.f32 %v632_v25 }
  0x97   :  { %vm84_vm7 = vmor %vm82_vm6, %vm83_vm5 }
  0x98   :  { %v78_v29 = vmul.f32 %v632_v25, %v77_v27  ;;  %v75_v30 = vsel %vm74_vm4, %v630_v19, %v71_v26 }
  0x99   :  { %v86_v31 = vmul.f32 %v75_v30, %v43_v0  ;;  %v180_v0 = vld [vmem:[#allocation4 + $0x48] sm:$0xff] }
  0x9a   :  { %v79_v32 = vmul.f32 0.5, %v78_v29 }
  0x9b   :  { %v89_v33 = vmul.f32 %v623_v28, %v86_v31 }
  0x9c   :  { %v80_v34 = vsub.f32 1.5, %v79_v32 }
  0x9d   :  { %577 = vmatmul.msk.f32.vlgmr.msra.gmra.mxu0 %vm48_vm0, %v89_v33 }
  0x9e   :  { %v81_v35 = vmul.f32 %v632_v25, %v80_v34 }
  0xa0   :  { %v85_v36 = vsel %vm84_vm7, %v632_v25, %v81_v35  ;;  %v177_v35 = vld [vmem:[#allocation4 + $0x30] sm:$0xff] }
  0xa1   :  { %v87_v37 = vmul.f32 %v85_v36, %v44_v2 }
  0xa3   :  { %v90_v38 = vmul.f32 %v623_v28, %v87_v37 }
  0xa5   :  { %578 = vmatmul.msk.f32.gmra.mxu0 %vm48_vm0, %v90_v38  ;;  %v178_v38 = vld [vmem:[#allocation4 + $0x38] sm:$0xff] }
 0x11a   :  { %v117_v39 = vpop.f32.mrf.mxu0 }
 0x11b   :  { %v768_v42 = vadd.f32 %v624_v40, %v117_v39 }
 0x122   :  { %v120_v41 = vpop.f32.mrf.mxu0 }
 0x123   :  { %v770_v43 = vadd.f32 %v624_v40, %v120_v41 }
 0x125   :  { %v603_v44 = vpack.i.bf16 %v768_v42, %v770_v43 }
 0x127   :  { %604 = vrot.lane.b32.xlu1 %v603_v44, %s738_s0 }
 0x12f   :  { %609 = vrot.lane.b32.xlu1 %v603_v44, %s739_s1 }
 0x199   :  { %v605_v45 = vpop.permute.xlu1 %604 }
 0x19a   :  { %v607_v46 = vunpack.i.h.bf16 %v605_v45  ;;  %v606_v47 = vunpack.i.l.bf16 %v605_v45  ;;  %614 = vrot.lane.b32.xlu2 %v605_v45, %s738_s0 }
 0x1a1   :  { %v610_v48 = vpop.permute.xlu1 %609 }
 0x1a2   :  { %619 = vrot.lane.b32.xlu2 %v610_v48, %s738_s0  ;;  %v328_v48 = vld [vmem:[#allocation4 + $0x50] sm:$0xff] }
 0x1a3   :  { %356 = vmatpush.msra.mxu2 %v328_v48 }
 0x1f4   :  { %v615_v49 = vpop.permute.xlu2 %614 }
 0x1f5   :  { %v616_v50 = vunpack.i.l.bf16 %v615_v49  ;;  %v617_v51 = vunpack.i.h.bf16 %v615_v49 }
 0x1f7   :  { %218 = vmatpush.msrb.mxu0 %v616_v50  ;;  %587 = vmatpush.msra.mxu1 %v616_v50 }
 0x1f9   :  { %219 = vmatpush.msrb.mxu0 %v617_v51  ;;  %588 = vmatpush.msra.mxu1 %v617_v51 }
 0x1fc   :  { %v620_v52 = vpop.permute.xlu2 %619 }
 0x1fd   :  { %v621_v53 = vunpack.i.l.bf16 %v620_v52  ;;  %v622_v54 = vunpack.i.h.bf16 %v620_v52 }
 0x1ff   :  { %220 = vmatpush.msrb.mxu0 %v621_v53  ;;  %589 = vmatpush.msra.mxu1 %v621_v53 }
 0x201   :  { %221 = vmatpush.msrb.mxu0 %v622_v54  ;;  %590 = vmatpush.msra.mxu1 %v622_v54 }
 0x203   :  { %222 = vmatpush.msrb.mxu0 %v606_v47  ;;  %591 = vmatpush.msra.mxu1 %v606_v47 }
 0x205   :  { %223 = vmatpush.msrb.mxu0 %v607_v46  ;;  %592 = vmatpush.msra.mxu1 %v607_v46 }
 0x206   :  { %581 = vmatmul.msk.f32.vlgmr.msra.gmra.mxu1 %vm195_vm8, %v175_v55  ;;  %579 = vmatmul.msk.f32.vlgmr.msrb.gmra.mxu0 %vm195_vm8, %v173_v56 }
 0x20e   :  { %582 = vmatmul.msk.f32.gmra.mxu1 %vm195_vm8, %v176_v57  ;;  %580 = vmatmul.msk.f32.gmra.mxu0 %vm195_vm8, %v174_v58  ;;  %vm325_vm8 = vcmask 130048  }
 0x283   :  { %v231_v60 = vpop.f32.mrf.mxu1  ;;  %v225_v34 = vpop.f32.mrf.mxu0 }
 0x284   :  { %v232_v61 = vadd.f32 %v231_v60, %v179_v59  ;;  %v226_v36 = vadd.f32 %v225_v34, %v177_v35  ;;  %v123_v34 = vsub.f32 0.0, %v768_v42 }
 0x286   :  { %v239_v62 = vsub.f32 0.0, %v232_v61  ;;  %v237_v37 = vsub.f32 0.0, %v226_v36  ;;  %v125_v35 = vmul.f32 1.442695, %v123_v34 }
 0x288   :  { %v245_v63 = vmul.f32 1.442695, %v239_v62  ;;  %v241_v40 = vmul.f32 1.442695, %v237_v37 }
 0x28a   :  { %633 = vpow2.f32 %v245_v63 }
 0x28b   :  { %v234_v1 = vpop.f32.mrf.mxu1  ;;  %v228_v39 = vpop.f32.mrf.mxu0 }
 0x28c   :  { %v235_v2 = vadd.f32 %v234_v1, %v180_v0  ;;  %v229_v41 = vadd.f32 %v228_v39, %v178_v38 }
 0x28e   :  { %v240_v3 = vsub.f32 0.0, %v235_v2  ;;  %v238_v44 = vsub.f32 0.0, %v229_v41 }
 0x290   :  { %v634_v4 = vpop.eup %633  ;;  %v247_v5 = vmul.f32 1.442695, %v240_v3  ;;  %v243_v45 = vmul.f32 1.442695, %v238_v44 }
 0x291   :  { %v251_v6 = vadd.f32 1.0, %v634_v4 }
 0x292   :  { %635 = vpow2.f32 %v247_v5 }
 0x293   :  { %637 = vrcp.f32 %v251_v6  ;;  %v294_v15 = vand.u32 2147483648, %v251_v6  ;;  %v292_v17 = vand.u32 2147483647, %v251_v6  ;;  %vm288_vm10 = vweird.f32 %v251_v6 }
 0x295   :  { %v295_v20 = vor.u32 1.1754944e-38, %v294_v15  ;;  %vm293_vm12 = vcmp.eq.f32.partialorder %v292_v17, 8.507059e+37 }
 0x298   :  { %v636_v7 = vpop.eup %635 }
 0x299   :  { %v638_v10 = vpop.eup %637  ;;  %v252_v11 = vadd.f32 1.0, %v636_v7 }
 0x29a   :  { %v284_v12 = vmul.f32 %v638_v10, %v251_v6  ;;  %vm289_vm9 = vweird.f32 %v638_v10 }
 0x29b   :  { %639 = vrcp.f32 %v252_v11  ;;  %vm290_vm11 = vmor %vm288_vm10, %vm289_vm9  ;;  %v309_v26 = vand.u32 2147483648, %v252_v11  ;;  %v307_v28 = vand.u32 2147483647, %v252_v11  ;;  %vm303_vm14 = vweird.f32 %v252_v11 }
 0x29c   :  { %v285_v14 = vsub.f32 1.0, %v284_v12  ;;  %641 = vpow2.f32 %v241_v40  ;;  %vm334_vm9 = vcmask 261120  }
 0x29d   :  { %v310_v30 = vor.u32 1.1754944e-38, %v309_v26  ;;  %vm308_vm0 = vcmp.eq.f32.partialorder %v307_v28, 8.507059e+37  ;;  %643 = vpow2.f32 %v243_v45 }
 0x29e   :  { %v286_v16 = vmul.f32 %v638_v10, %v285_v14 }
 0x2a0   :  { %v287_v18 = vadd.f32 %v638_v10, %v286_v16 }
 0x2a1   :  { %v640_v19 = vpop.eup %639 }
 0x2a2   :  { %v291_v21 = vsel %vm290_vm11, %v638_v10, %v287_v18  ;;  %v299_v22 = vmul.f32 %v640_v19, %v252_v11  ;;  %vm304_vm13 = vweird.f32 %v640_v19  ;;  %v642_v46 = vpop.eup %641 }
 0x2a3   :  { %v296_v23 = vsel %vm293_vm12, %v295_v20, %v291_v21  ;;  %vm305_vm15 = vmor %vm303_vm14, %vm304_vm13  ;;  %v249_v47 = vadd.f32 1.0, %v642_v46  ;;  %v644_v49 = vpop.eup %643 }
 0x2a4   :  { %v315_v24 = vmul.f32 %v296_v23, %v232_v61  ;;  %v300_v25 = vsub.f32 1.0, %v299_v22  ;;  %v250_v50 = vadd.f32 1.0, %v644_v49 }
 0x2a5   :  { %645 = vrcp.f32 %v249_v47  ;;  %vm258_vm1 = vweird.f32 %v249_v47  ;;  %v264_v57 = vand.u32 2147483648, %v249_v47  ;;  %v262_v59 = vand.u32 2147483647, %v249_v47 }
 0x2a6   :  { %v301_v27 = vmul.f32 %v640_v19, %v300_v25  ;;  %319 = vrot.lane.b32.xlu0 %v315_v24, %s739_s1  ;;  %647 = vrcp.f32 %v250_v50  ;;  %vm273_vm5 = vweird.f32 %v250_v50  ;;  %v279_v1 = vand.u32 2147483648, %v250_v50 }
 0x2a7   :  { %v265_v61 = vor.u32 1.1754944e-38, %v264_v57  ;;  %vm263_vm4 = vcmp.eq.f32.partialorder %v262_v59, 8.507059e+37  ;;  %v277_v3 = vand.u32 2147483647, %v250_v50 }
 0x2a8   :  { %v302_v29 = vadd.f32 %v640_v19, %v301_v27  ;;  %v280_v5 = vor.u32 1.1754944e-38, %v279_v1 }
 0x2a9   :  { %vm278_vm10 = vcmp.eq.f32.partialorder %v277_v3, 8.507059e+37 }
 0x2aa   :  { %v306_v31 = vsel %vm305_vm15, %v640_v19, %v302_v29 }
 0x2ab   :  { %v311_v32 = vsel %vm308_vm0, %v310_v30, %v306_v31  ;;  %v646_v51 = vpop.eup %645 }
 0x2ac   :  { %v316_v33 = vmul.f32 %v311_v32, %v235_v2  ;;  %v254_v52 = vmul.f32 %v646_v51, %v249_v47  ;;  %v648_v54 = vpop.eup %647  ;;  %vm259_vm2 = vweird.f32 %v646_v51 }
 0x2ad   :  { %v269_v56 = vmul.f32 %v648_v54, %v250_v50  ;;  %vm260_vm3 = vmor %vm258_vm1, %vm259_vm2  ;;  %vm274_vm6 = vweird.f32 %v648_v54 }
 0x2ae   :  { %321 = vrot.lane.b32.xlu1 %v316_v33, %s739_s1  ;;  %v255_v53 = vsub.f32 1.0, %v254_v52  ;;  %vm275_vm7 = vmor %vm273_vm5, %vm274_vm6 }
 0x2af   :  { %v270_v60 = vsub.f32 1.0, %v269_v56 }
 0x2b0   :  { %v256_v55 = vmul.f32 %v646_v51, %v255_v53 }
 0x2b1   :  { %v271_v63 = vmul.f32 %v648_v54, %v270_v60 }
 0x2b2   :  { %v257_v58 = vadd.f32 %v646_v51, %v256_v55 }
 0x2b3   :  { %v272_v2 = vadd.f32 %v648_v54, %v271_v63 }
 0x2b4   :  { %v261_v62 = vsel %vm260_vm3, %v646_v51, %v257_v58 }
 0x2b5   :  { %v266_v0 = vsel %vm263_vm4, %v265_v61, %v261_v62  ;;  %v276_v7 = vsel %vm275_vm7, %v648_v54, %v272_v2 }
 0x2b6   :  { %v313_v4 = vmul.f32 %v266_v0, %v226_v36  ;;  %v281_v9 = vsel %vm278_vm10, %v280_v5, %v276_v7 }
 0x2b7   :  { %v314_v10 = vmul.f32 %v281_v9, %v229_v41 }
 0x318   :  { %v320_v6 = vpop.permute.xlu0 %319 }
 0x319   :  { %v326_v8 = vsel %vm325_vm8, %v313_v4, %v320_v6 }
 0x31a   :  { %583 = vmatmul.msk.f32.vlgmr.msra.gmra.mxu2 %vm334_vm9, %v326_v8 }
 0x320   :  { %v322_v11 = vpop.permute.xlu1 %321 }
 0x321   :  { %v327_v12 = vsel %vm325_vm8, %v314_v10, %v322_v11 }
 0x322   :  { %584 = vmatmul.msk.f32.gmra.mxu2 %vm334_vm9, %v327_v12 }
 0x39d   :  { %v358_v14 = vpop.f32.mrf.mxu2 }
 0x39e   :  { %v782_v15 = vadd.f32 %v625_v13, %v358_v14 }
 0x3a0   :  { %390 = vrot.lane.b32.xlu2 %v782_v15, %s739_s1  ;;  %v366_v16 = vmul.f32 1.442695, %v782_v15  ;;  %vm364_vm11 = vcmp.gt.f32.partialorder %v782_v15, 20.0 }
 0x3a2   :  { %649 = vpow2.f32 %v366_v16 }
 0x3a5   :  { %v361_v17 = vpop.f32.mrf.mxu2 }
 0x3a6   :  { %v787_v18 = vadd.f32 %v625_v13, %v361_v17  ;;  %v124_v13 = vsub.f32 0.0, %v770_v43 }
 0x3a8   :  { %v650_v19 = vpop.eup %649  ;;  %392 = vrot.lane.b32.xlu1 %v787_v18, %s739_s1  ;;  %v368_v20 = vmul.f32 1.442695, %v787_v18  ;;  %vm365_vm12 = vcmp.gt.f32.partialorder %v787_v18, 20.0  ;;  %v127_v16 = vmul.f32 1.442695, %v124_v13 }
 0x3a9   :  { %v370_v21 = vadd.f32 1.0, %v650_v19 }
 0x3aa   :  { %651 = vpow2.f32 %v368_v20 }
 0x3ab   :  { %653 = vlog2.f32 %v370_v21 }
 0x3b0   :  { %v652_v22 = vpop.eup %651 }
 0x3b1   :  { %v654_v23 = vpop.eup %653  ;;  %v371_v24 = vadd.f32 1.0, %v652_v22 }
 0x3b2   :  { %v373_v25 = vmul.f32 0.6931472, %v654_v23 }
 0x3b3   :  { %655 = vlog2.f32 %v371_v24 }
 0x3b4   :  { %v376_v26 = vsel %vm364_vm11, %v782_v15, %v373_v25  ;;  %657 = vpow2.f32 %v125_v35 }
 0x3b5   :  { %454 = vrot.lane.b32.xlu0 %v376_v26, %s740_s21 }
 0x3b9   :  { %v656_v27 = vpop.eup %655 }
 0x3ba   :  { %v375_v28 = vmul.f32 0.6931472, %v656_v27  ;;  %v658_v36 = vpop.eup %657 }
 0x3bb   :  { %v129_v37 = vadd.f32 1.0, %v658_v36 }
 0x3bc   :  { %v377_v29 = vsel %vm365_vm12, %v787_v18, %v375_v28 }
 0x3bd   :  { %456 = vrot.lane.b32.xlu0 %v377_v29, %s740_s21  ;;  %659 = vrcp.f32 %v129_v37  ;;  %v142_v49 = vand.u32 2147483648, %v129_v37  ;;  %vm136_vm14 = vweird.f32 %v129_v37  ;;  %v140_v50 = vand.u32 2147483647, %v129_v37 }
 0x3bf   :  { %v143_v52 = vor.u32 1.1754944e-38, %v142_v49  ;;  %vm141_vm0 = vcmp.eq.f32.partialorder %v140_v50, 8.507059e+37 }
 0x3c3   :  { %v660_v40 = vpop.eup %659 }
 0x3c4   :  { %v132_v41 = vmul.f32 %v660_v40, %v129_v37  ;;  %vm137_vm13 = vweird.f32 %v660_v40 }
 0x3c5   :  { %380 = vrot.lane.b32.xlu0 %v376_v26, %s741_s22  ;;  %vm138_vm15 = vmor %vm136_vm14, %vm137_vm13 }
 0x3c6   :  { %v133_v46 = vsub.f32 1.0, %v132_v41 }
 0x3c8   :  { %v134_v47 = vmul.f32 %v660_v40, %v133_v46 }
 0x3ca   :  { %v135_v48 = vadd.f32 %v660_v40, %v134_v47 }
 0x3cc   :  { %v139_v51 = vsel %vm138_vm15, %v660_v40, %v135_v48 }
 0x3cd   :  { %v144_v53 = vsel %vm141_vm0, %v143_v52, %v139_v51 }
 0x3ce   :  { %v161_v54 = vmul.f32 %v144_v53, %v768_v42 }
 0x3fa   :  { %v391_v30 = vpop.permute.xlu2 %390 }
 0x3fb   :  { %v396_v31 = vmul.f32 %v391_v30, %v782_v15 }
 0x3fd   :  { %462 = vrot.lane.b32.xlu2 %v396_v31, %s739_s1 }
 0x405   :  { %400 = vrot.lane.b32.xlu2 %v396_v31, %s740_s21 }
 0x41a   :  { %v393_v32 = vpop.permute.xlu1 %392 }
 0x41b   :  { %v397_v33 = vmul.f32 %v393_v32, %v787_v18 }
 0x41d   :  { %464 = vrot.lane.b32.xlu1 %v397_v33, %s739_s1  ;;  %402 = vrot.lane.b32.xlu2 %v397_v33, %s740_s21 }
 0x427   :  { %v455_v59 = vpop.permute.xlu0 %454 }
 0x428   :  { %v460_v60 = vmul.f32 %v455_v59, %v782_v15 }
 0x42f   :  { %v457_v14 = vpop.permute.xlu0 %456 }
 0x430   :  { %v461_v17 = vmul.f32 %v457_v14, %v787_v18 }
 0x437   :  { %v381_v20 = vpop.permute.xlu0 %380 }
 0x438   :  { %v386_v27 = vmul.f32 %v381_v20, %v782_v15 }
 0x457   :  { %v463_v38 = vpop.permute.xlu2 %462 }
 0x458   :  { %v468_v39 = vsel %vm325_vm8, %v463_v38, 0.0 }
 0x459   :  { %469 = vadd.xlane.f32.xlu1 %v468_v39 }
 0x45f   :  { %v401_v44 = vpop.permute.xlu2 %400 }
 0x460   :  { %v406_v45 = vsel %vm325_vm8, %v401_v44, 0.0 }
 0x461   :  { %407 = vadd.xlane.f32.xlu0 %v406_v45 }
 0x472   :  { %382 = vrot.lane.b32.xlu1 %v377_v29, %s741_s22 }
 0x475   :  { %528 = vrot.lane.b32.xlu0 %v161_v54, %s742_s23 }
 0x477   :  { %v403_v57 = vpop.permute.xlu2 %402 }
 0x478   :  { %v409_v58 = vsel %vm325_vm8, %v403_v57, 0.0  ;;  %v537_v57 = vld [vmem:[#allocation4 + $0x78] sm:$0xff] }
 0x479   :  { %560 = vmatpush.msra.mxu3 %v537_v57 }
 0x48f   :  { %v465_v55 = vpop.permute.xlu1 %464 }
 0x490   :  { %v471_v56 = vsel %vm325_vm8, %v465_v55, 0.0 }
 0x491   :  { %472 = vadd.xlane.f32.xlu2 %v471_v56 }
 0x499   :  { %410 = vadd.xlane.f32.xlu2 %v409_v58  ;;  %v536_v58 = vld [vmem:[#allocation4 + $0x70] sm:$0xff] }
 0x49a   :  { %561 = vmatpush.msra.mxu3 %v536_v58 }
 0x4cc   :  { %v470_v61 = vpop.xlane.xlu1 %469 }
 0x4cd   :  { %v474_v62 = vmul.f32 %v470_v61, %v460_v60 }
 0x4cf   :  { %v476_v63 = vsub.f32 0.0, %v474_v62 }
 0x4d1   :  { %v478_v0 = vmul.f32 1.442695, %v476_v63 }
 0x4d3   :  { %661 = vpow2.f32 %v478_v0 }
 0x4d4   :  { %v408_v26 = vpop.xlane.xlu0 %407 }
 0x4d5   :  { %v412_v28 = vmul.f32 %v408_v26, %v386_v27 }
 0x4d7   :  { %v414_v32 = vsub.f32 0.0, %v412_v28 }
 0x4d9   :  { %v662_v42 = vpop.eup %661  ;;  %v416_v34 = vmul.f32 1.442695, %v414_v32 }
 0x4da   :  { %v482_v1 = vadd.f32 1.0, %v662_v42 }
 0x4dc   :  { %663 = vrcp.f32 %v482_v1  ;;  %v495_v5 = vand.u32 2147483648, %v482_v1  ;;  %v493_v7 = vand.u32 2147483647, %v482_v1  ;;  %vm489_vm2 = vweird.f32 %v482_v1 }
 0x4dd   :  { %665 = vpow2.f32 %v127_v16 }
 0x4de   :  { %v496_v9 = vor.u32 1.1754944e-38, %v495_v5  ;;  %vm494_vm4 = vcmp.eq.f32.partialorder %v493_v7, 8.507059e+37 }
 0x4e2   :  { %v664_v2 = vpop.eup %663 }
 0x4e3   :  { %v485_v3 = vmul.f32 %v664_v2, %v482_v1  ;;  %vm490_vm1 = vweird.f32 %v664_v2  ;;  %v666_v22 = vpop.eup %665 }
 0x4e4   :  { %vm491_vm3 = vmor %vm489_vm2, %vm490_vm1  ;;  %v130_v25 = vadd.f32 1.0, %v666_v22 }
 0x4e5   :  { %v486_v4 = vsub.f32 1.0, %v485_v3 }
 0x4e6   :  { %v157_v50 = vand.u32 2147483648, %v130_v25  ;;  %vm151_vm11 = vweird.f32 %v130_v25  ;;  %v155_v53 = vand.u32 2147483647, %v130_v25 }
 0x4e7   :  { %v487_v6 = vmul.f32 %v664_v2, %v486_v4 }
 0x4e8   :  { %v158_v55 = vor.u32 1.1754944e-38, %v157_v50  ;;  %vm156_vm13 = vcmp.eq.f32.partialorder %v155_v53, 8.507059e+37 }
 0x4e9   :  { %v488_v8 = vadd.f32 %v664_v2, %v487_v6 }
 0x4eb   :  { %v492_v10 = vsel %vm491_vm3, %v664_v2, %v488_v8  ;;  %v529_v8 = vpop.permute.xlu0 %528 }
 0x4ec   :  { %v497_v11 = vsel %vm494_vm4, %v496_v9, %v492_v10  ;;  %v383_v10 = vpop.permute.xlu1 %382 }
 0x4ed   :  { %v514_v12 = vmul.f32 %v497_v11, %v474_v62  ;;  %v387_v11 = vmul.f32 %v383_v10, %v787_v18 }
 0x4ef   :  { %518 = vrot.lane.b32.xlu2 %v514_v12, %s738_s0 }
 0x504   :  { %v473_v19 = vpop.xlane.xlu2 %472 }
 0x505   :  { %v475_v21 = vmul.f32 %v473_v19, %v461_v17 }
 0x507   :  { %v477_v23 = vsub.f32 0.0, %v475_v21 }
 0x509   :  { %v480_v24 = vmul.f32 1.442695, %v477_v23 }
 0x50b   :  { %667 = vpow2.f32 %v480_v24 }
 0x50c   :  { %669 = vrcp.f32 %v130_v25  ;;  %v411_v2 = vpop.xlane.xlu2 %410 }
 0x50d   :  { %v413_v12 = vmul.f32 %v411_v2, %v387_v11 }
 0x50f   :  { %v415_v13 = vsub.f32 0.0, %v413_v12 }
 0x511   :  { %v668_v29 = vpop.eup %667  ;;  %v418_v14 = vmul.f32 1.442695, %v415_v13 }
 0x512   :  { %v483_v30 = vadd.f32 1.0, %v668_v29  ;;  %v670_v31 = vpop.eup %669 }
 0x513   :  { %v147_v33 = vmul.f32 %v670_v31, %v130_v25  ;;  %vm152_vm10 = vweird.f32 %v670_v31 }
 0x514   :  { %671 = vrcp.f32 %v483_v30  ;;  %v510_v39 = vand.u32 2147483648, %v483_v30  ;;  %v508_v41 = vand.u32 2147483647, %v483_v30  ;;  %vm504_vm6 = vweird.f32 %v483_v30  ;;  %vm153_vm12 = vmor %vm151_vm11, %vm152_vm10 }
 0x515   :  { %v148_v37 = vsub.f32 1.0, %v147_v33  ;;  %673 = vpow2.f32 %v416_v34  ;;  %v626_v33 = vld [vmem:[#allocation4 + $0x3] ss:$0 sm:$0xff] }
 0x516   :  { %v511_v46 = vor.u32 1.1754944e-38, %v510_v39  ;;  %vm509_vm9 = vcmp.eq.f32.partialorder %v508_v41, 8.507059e+37 }
 0x517   :  { %v149_v44 = vmul.f32 %v670_v31, %v148_v37 }
 0x519   :  { %v150_v48 = vadd.f32 %v670_v31, %v149_v44 }
 0x51a   :  { %v672_v35 = vpop.eup %671 }
 0x51b   :  { %v500_v36 = vmul.f32 %v672_v35, %v483_v30  ;;  %vm505_vm5 = vweird.f32 %v672_v35  ;;  %v674_v15 = vpop.eup %673  ;;  %v154_v54 = vsel %vm153_vm12, %v670_v31, %v150_v48 }
 0x51c   :  { %vm506_vm7 = vmor %vm504_vm6, %vm505_vm5  ;;  %v420_v51 = vadd.f32 1.0, %v674_v15  ;;  %v159_v56 = vsel %vm156_vm13, %v158_v55, %v154_v54 }
 0x51d   :  { %v501_v38 = vsub.f32 1.0, %v500_v36  ;;  %v162_v59 = vmul.f32 %v159_v56, %v770_v43 }
 0x51e   :  { %675 = vrcp.f32 %v420_v51  ;;  %v433_v42 = vand.u32 2147483648, %v420_v51  ;;  %vm427_vm15 = vweird.f32 %v420_v51  ;;  %v431_v1 = vand.u32 2147483647, %v420_v51 }
 0x51f   :  { %v502_v40 = vmul.f32 %v672_v35, %v501_v38  ;;  %677 = vpow2.f32 %v418_v14 }
 0x520   :  { %v434_v4 = vor.u32 1.1754944e-38, %v433_v42  ;;  %vm432_vm1 = vcmp.eq.f32.partialorder %v431_v1, 8.507059e+37 }
 0x521   :  { %v503_v45 = vadd.f32 %v672_v35, %v502_v40 }
 0x523   :  { %v507_v47 = vsel %vm506_vm7, %v672_v35, %v503_v45 }
 0x524   :  { %v512_v49 = vsel %vm509_vm9, %v511_v46, %v507_v47  ;;  %v676_v60 = vpop.eup %675 }
 0x525   :  { %v515_v52 = vmul.f32 %v512_v49, %v475_v21  ;;  %v423_v61 = vmul.f32 %v676_v60, %v420_v51  ;;  %vm428_vm14 = vweird.f32 %v676_v60  ;;  %v678_v16 = vpop.eup %677 }
 0x526   :  { %vm429_vm0 = vmor %vm427_vm15, %vm428_vm14  ;;  %v421_v17 = vadd.f32 1.0, %v678_v16 }
 0x527   :  { %520 = vrot.lane.b32.xlu1 %v515_v52, %s738_s0  ;;  %v424_v62 = vsub.f32 1.0, %v423_v61 }
 0x528   :  { %679 = vrcp.f32 %v421_v17  ;;  %v448_v24 = vand.u32 2147483648, %v421_v17  ;;  %vm442_vm3 = vweird.f32 %v421_v17  ;;  %v446_v25 = vand.u32 2147483647, %v421_v17 }
 0x529   :  { %v425_v63 = vmul.f32 %v676_v60, %v424_v62 }
 0x52a   :  { %v449_v27 = vor.u32 1.1754944e-38, %v448_v24  ;;  %vm447_vm5 = vcmp.eq.f32.partialorder %v446_v25, 8.507059e+37 }
 0x52b   :  { %v426_v0 = vadd.f32 %v676_v60, %v425_v63 }
 0x52d   :  { %v430_v3 = vsel %vm429_vm0, %v676_v60, %v426_v0 }
 0x52e   :  { %v435_v5 = vsel %vm432_vm1, %v434_v4, %v430_v3  ;;  %v680_v19 = vpop.eup %679 }
 0x52f   :  { %530 = vrot.lane.b32.xlu1 %v162_v59, %s742_s23  ;;  %v452_v6 = vmul.f32 %v435_v5, %v412_v28  ;;  %v438_v20 = vmul.f32 %v680_v19, %v421_v17  ;;  %vm443_vm2 = vweird.f32 %v680_v19 }
 0x530   :  { %vm444_vm4 = vmor %vm442_vm3, %vm443_vm2 }
 0x531   :  { %v439_v21 = vsub.f32 1.0, %v438_v20 }
 0x533   :  { %v440_v22 = vmul.f32 %v680_v19, %v439_v21 }
 0x535   :  { %v441_v23 = vadd.f32 %v680_v19, %v440_v22 }
 0x537   :  { %v445_v26 = vsel %vm444_vm4, %v680_v19, %v441_v23 }
 0x538   :  { %v450_v28 = vsel %vm447_vm5, %v449_v27, %v445_v26 }
 0x539   :  { %v453_v29 = vmul.f32 %v450_v28, %v413_v12 }
 0x549   :  { %v519_v43 = vpop.permute.xlu2 %518 }
 0x54a   :  { %v524_v7 = vadd.f32 %v519_v43, %v452_v6 }
 0x54c   :  { %v534_v9 = vmul.f32 %v529_v8, %v524_v7 }
 0x54e   :  { %585 = vmatmul.msk.f32.vlgmr.msra.gmra.mxu3 %vm325_vm8, %v534_v9 }
 0x599   :  { %v521_v18 = vpop.permute.xlu1 %520 }
 0x59a   :  { %v525_v30 = vadd.f32 %v521_v18, %v453_v29 }
 0x5a1   :  { %v531_v31 = vpop.permute.xlu1 %530 }
 0x5a2   :  { %v535_v32 = vmul.f32 %v531_v31, %v525_v30 }
 0x5a4   :  { %586 = vmatmul.msk.f32.gmra.mxu3 %vm325_vm8, %v535_v32 }
 0x5d1   :  { %v563_v34 = vpop.f32.mrf.mxu3 }
 0x5d2   :  { %v564_v35 = vadd.f32 %v626_v33, %v563_v34 }
 0x5d4   :  { %569 = vst [vmem:[%s828_s2] sm:$0xff] %v564_v35 }
 0x627   :  { %v566_v36 = vpop.f32.mrf.mxu3 }
 0x628   :  { %v567_v37 = vadd.f32 %v626_v33, %v566_v36 }
 0x62a   :  { %570 = vst [vmem:[%s828_s2 + $0x8] sm:$0xff] %v567_v37 }
 0x62b   :  { %575 = vsyncpa [#allocation3], 1 }
 0x62c   :  { %576 = vsyncpa [#allocation5], 1 }

</bundles_post_ra>
